<compile_context>
chip_gen: v5e
topology: v5e:2x2
jax: 0.10.0
libtpu: 0.0.40
codegen_flags: <defaults>
</compile_context>

<pallas_src>
import functools

import jax
import jax.numpy as jnp
from jax.experimental import pallas as pl
from jax.experimental.pallas import tpu as pltpu


def _round_up(x, m):
    return ((x + m - 1) // m) * m


def _default_num_cores():
    """2 TensorCores per device on v4/v5p (megacore) and v7x; 1 on v5e/v6e."""
    try:
        kind = jax.devices()[0].device_kind.lower()
    except Exception:
        return 1
    if ("v4" in kind) or ("v5p" in kind) or ("v7" in kind):
        return 2
    return 1


def _vmem_capacity_bytes():
    try:
        return int(pltpu.get_tpu_info().vmem_capacity_bytes)
    except Exception:
        return 64 << 20  # conservative default (v7x has the smallest VMEM)


def _focal_loss_kernel(x_ref, out_ref, *, gamma, num_classes, stash_col):
    i = pl.program_id(1)  # inner (reduction) axis over batch tiles

    @pl.when(i == 0)
    def _():
        out_ref[...] = jnp.zeros_like(out_ref)

    x = x_ref[...].astype(jnp.float32)                 # (TB, Cp)
    cp = x.shape[-1]
    class_ids = jax.lax.broadcasted_iota(jnp.int32, (1, cp), 1)

    # Recover the per-row target index from the stash lane (single select + lane-reduce).
    t_f = jnp.sum(jnp.where(class_ids == stash_col, x, 0.0), axis=-1, keepdims=True)  # (TB,1)
    tgt = t_f.astype(jnp.int32)                        # exact: class idx guarded in wrapper
    valid = (t_f >= 0.0).astype(jnp.float32)           # padded rows carry target = -1

    # Neutralize every non-class lane (padding + stash) for the logsumexp.
    neg = jnp.float32(-1e30)
    xm = jnp.where(class_ids < num_classes, x, neg)

    # Numerically stable logsumexp over classes.
    m = jnp.max(xm, axis=-1, keepdims=True)            # (TB, 1)
    lse = m + jnp.log(jnp.sum(jnp.exp(xm - m), axis=-1, keepdims=True))

    # Target-class logit: select + lane-reduce (no one-hot convert+multiply).
    tgt_logit = jnp.sum(jnp.where(class_ids == tgt, xm, 0.0), axis=-1, keepdims=True)

    ce = lse - tgt_logit                               # (TB, 1)
    pt = jnp.exp(-ce)
    q = jnp.maximum(1.0 - pt, 0.0)                     # clamp ULP overshoot of pt > 1

    # (1 - pt) ** gamma : repeated multiply for small integer gamma (pure VPU).
    if float(gamma) == int(gamma) and 0 <= int(gamma) <= 8:
        w = jnp.ones_like(q)
        for _ in range(int(gamma)):
            w = w * q
    else:
        w = jnp.power(q, gamma)

    focal = w * ce * valid                             # raw (no alpha, no 1/N)
    out_ref[...] += jnp.sum(focal)                     # scalar broadcast into (1,128) block


def focal_loss(logits, targets, *, alpha=1.0, gamma=2.0, reduction="mean",
               tile_b=None, num_cores=None):
    """Equivalent of FocalLoss(alpha, gamma, reduction)(logits, targets).

    logits:  float array [N, C]  (f32 or bf16 -- bf16 halves HBM traffic; the kernel
             upcasts per tile, and the kernel is HBM-roofline-bound on v5e/v6e/v7x)
    targets: int array   [N]
    returns: scalar float32 ('mean' or 'sum')
    """
    if reduction == "none":
        # TODO(synk): per-row ('none') reduction needs a per-tile output variant; only 'mean'/'sum' are fused.
        raise NotImplementedError("Pallas focal_loss supports reduction='mean'|'sum'")

    n, c = logits.shape
    dt = jnp.dtype(logits.dtype)

    # The target index is stored as a float in the logits dtype; make sure it is exactly
    # representable (bf16: 256, f16: 2048, f32: 2^24).  Practically never triggered.
    exact_limit = {"bfloat16": 256, "float16": 2048}.get(dt.name, 1 << 24)
    if c > exact_limit:
        logits = logits.astype(jnp.float32)
        dt = jnp.dtype(jnp.float32)
    itemsize = dt.itemsize

    # Always reserve >= 1 spare lane in the padded class dim for the target stash.
    c_pad = _round_up(c + 1, 128)
    stash_col = c_pad - 1

    if num_cores is None:
        num_cores = _default_num_cores()
    num_cores = max(1, int(num_cores))

    # ---- generation-aware tile sizing -------------------------------------------------
    vmem_cap = _vmem_capacity_bytes()
    vmem_limit = (vmem_cap * 3) // 4               # 96 MiB on v5e/v6e, 48 MiB on v7x
    tile_budget = (vmem_cap * 2) // 5              # ~40% of VMEM for tiles + f32 temps

    granule = {4: 8, 2: 16, 1: 32}.get(itemsize, 8)   # dtype-aware sublane granularity

    # Per-row VMEM cost: double-buffered input tile + ~3 full-width f32 temps
    # (upcast x, masked xm, exp(xm - m)) + small per-row f32 columns.
    row_bytes = 2 * c_pad * itemsize + 3 * c_pad * 4 + 128
    if tile_b is None:
        tile_b = tile_budget // row_bytes
        tile_b = max(granule, min(32768, (tile_b // granule) * granule))
    per_core_rows = _round_up(-(-n // num_cores), granule)
    tile_b = int(min(int(tile_b), per_core_rows))
    tile_b = max(granule, (tile_b // granule) * granule)

    tiles_per_core = -(-per_core_rows // tile_b)
    n_pad = num_cores * tiles_per_core * tile_b

    # ---- build the single input stream (logits + stashed targets) ----------------------
    pad_val = max(-1e30, float(jnp.finfo(dt).min))   # finite; kernel re-masks anyway
    x = jnp.pad(logits, ((0, 0), (0, c_pad - c)), constant_values=pad_val)
    tgt = targets.astype(jnp.int32)
    if n_pad != n:
        x = jnp.pad(x, ((0, n_pad - n), (0, 0)))
        tgt = jnp.pad(tgt, (0, n_pad - n), constant_values=-1)   # masked in-kernel
    x = x.at[:, stash_col].set(tgt.astype(dt))

    kernel = functools.partial(_focal_loss_kernel, gamma=float(gamma),
                               num_classes=int(c), stash_col=int(stash_col))

    cost = pl.CostEstimate(
        flops=int(6 * n_pad * c_pad),
        transcendentals=int(n_pad * c_pad + 2 * n_pad),
        bytes_accessed=int(n_pad * c_pad * itemsize + num_cores * 512),
    )

    out = pl.pallas_call(
        kernel,
        out_shape=jax.ShapeDtypeStruct((1, num_cores * 128), jnp.float32),
        grid_spec=pltpu.PrefetchScalarGridSpec(
            num_scalar_prefetch=0,
            grid=(num_cores, tiles_per_core),      # (core split, batch-tile reduction)
            in_specs=[
                pl.BlockSpec((tile_b, c_pad),
                             lambda cc, i: (cc * tiles_per_core + i, 0)),
            ],
            # Each core accumulates into its own lane-dense (1,128) block (race-free).
            out_specs=pl.BlockSpec((1, 128), lambda cc, i: (0, cc)),
        ),
        compiler_params=pltpu.CompilerParams(
            dimension_semantics=("parallel", "arbitrary"),
            vmem_limit_bytes=int(vmem_limit),
        ),
        cost_estimate=cost,
    )(x)

    per_core = out.reshape(num_cores, 128)[:, 0]   # one partial sum per core
    total = jnp.float32(alpha) * jnp.sum(per_core)
    if reduction == "mean":
        return total / jnp.float32(n)
    return total                                   # 'sum'


def _focal_loss_ref(logits, targets, alpha=1.0, gamma=2.0):
    # Pure-JAX reference mirroring the PyTorch module (reduction='mean').
    logp = jax.nn.log_softmax(logits.astype(jnp.float32), axis=-1)
    ce = -jnp.take_along_axis(logp, targets[:, None].astype(jnp.int32), axis=-1)[:, 0]
    pt = jnp.exp(-ce)
    return jnp.mean(alpha * (1.0 - pt) ** gamma * ce)


if __name__ == "__main__":
    key = jax.random.PRNGKey(0)
    k1, k2 = jax.random.split(key)

    # Small shapes consistent with a classifier head: batch=16, classes=10.
    N, C = 16, 10
    logits = jax.random.normal(k1, (N, C), dtype=jnp.float32) * 2.0
    targets = jax.random.randint(k2, (N,), 0, C, dtype=jnp.int32)

    out = focal_loss(logits, targets, alpha=1.0, gamma=2.0)
    out = jax.block_until_ready(out)
    ref = _focal_loss_ref(logits, targets, 1.0, 2.0)
    assert jnp.allclose(out, ref, atol=1e-5, rtol=1e-5), (out, ref)

    # Ragged batch (exercises batch padding + in-kernel row masking).
    N2 = 13
    out2 = focal_loss(logits[:N2], targets[:N2], alpha=0.5, gamma=2.0)
    out2 = jax.block_until_ready(out2)
    ref2 = _focal_loss_ref(logits[:N2], targets[:N2], 0.5, 2.0)
    assert jnp.allclose(out2, ref2, atol=1e-5, rtol=1e-5), (out2, ref2)

    # 'sum' reduction.
    out3 = focal_loss(logits, targets, alpha=1.0, gamma=2.0, reduction="sum")
    out3 = jax.block_until_ready(out3)
    ref3 = _focal_loss_ref(logits, targets, 1.0, 2.0) * N
    assert jnp.allclose(out3, ref3, atol=1e-4, rtol=1e-5), (out3, ref3)

    # bf16 fast path (halved HBM traffic; dtype-aware 16-row granularity; stashed targets
    # remain exactly representable for small class counts).
    N3 = 32
    logits_bf16 = (jax.random.normal(k1, (N3, C), dtype=jnp.float32) * 2.0).astype(jnp.bfloat16)
    targets3 = jax.random.randint(k2, (N3,), 0, C, dtype=jnp.int32)
    out4 = focal_loss(logits_bf16, targets3, alpha=1.0, gamma=2.0)
    out4 = jax.block_until_ready(out4)
    ref4 = _focal_loss_ref(logits_bf16, targets3, 1.0, 2.0)
    assert jnp.allclose(out4, ref4, atol=1e-3, rtol=1e-3), (out4, ref4)

    print("KERNEL_OK")
</pallas_src>

<mosaic_0001>
module attributes {stable_mosaic.version = 11 : i64} {
  func.func @_focal_loss_kernel(%arg0: i32, %arg1: i32, %arg2: memref<16x128xf32, #tpu.memory_space<vmem>>, %arg3: memref<1x128xf32, #tpu.memory_space<vmem>>) attributes {dimension_semantics = [#tpu.dimension_semantics<parallel>, #tpu.dimension_semantics<arbitrary>], iteration_bounds = array<i64: 1, 1>, scalar_prefetch = 0 : i64, scratch_operands = 0 : i64, tpu.core_type = #tpu.core_type<tc>, window_params = [{transform_indices = @transform_0, window_bounds = array<i64: 16, 128>}, {transform_indices = @transform_1, window_bounds = array<i64: 1, 128>}]} {
    %c0_i32 = arith.constant 0 : i32
    %0 = arith.cmpi eq, %arg1, %c0_i32 : i32
    %1 = arith.extui %0 : i1 to i32
    %c0_i32_0 = arith.constant 0 : i32
    %2 = arith.cmpi ne, %1, %c0_i32_0 : i32
    scf.if %2 {
      %cst_18 = arith.constant 0.000000e+00 : f32
      %61 = vector.broadcast %cst_18 : f32 to vector<1x128xf32>
      %c0_19 = arith.constant 0 : index
      %c0_20 = arith.constant 0 : index
      %62 = vector.load %arg3[%c0_19, %c0_20] : memref<1x128xf32, #tpu.memory_space<vmem>>, vector<1x128xf32>
      tpu.vector_store %arg3[%c0_19, %c0_20], %61 {strides = array<i32>} : memref<1x128xf32, #tpu.memory_space<vmem>>, vector<1x128xf32>,
    } else {
    }
    %c0 = arith.constant 0 : index
    %c0_1 = arith.constant 0 : index
    %3 = vector.load %arg2[%c0, %c0_1] : memref<16x128xf32, #tpu.memory_space<vmem>>, vector<16x128xf32>
    %4 = tpu.iota {dimensions = array<i32: 1>} : vector<1x128xi32>
    %c127_i32 = arith.constant 127 : i32
    %5 = vector.broadcast %c127_i32 : i32 to vector<1x128xi32>
    %6 = arith.cmpi eq, %4, %5 : vector<1x128xi32>
    %cst = arith.constant 0.000000e+00 : f32
    %7 = vector.shape_cast %6 : vector<1x128xi1> to vector<1x128xi1>
    %8 = vector.broadcast %7 : vector<1x128xi1> to vector<16x128xi1>
    %9 = vector.broadcast %cst : f32 to vector<16x128xf32>
    %10 = arith.select %8, %3, %9 : vector<16x128xi1>, vector<16x128xf32>
    %cst_2 = arith.constant dense<0.000000e+00> : vector<16xf32>
    %11 = vector.multi_reduction <add>, %10, %cst_2 [1] : vector<16x128xf32> to vector<16xf32>
    %12 = vector.shape_cast %11 : vector<16xf32> to vector<16x1xf32>
    %13 = arith.fptosi %12 : vector<16x1xf32> to vector<16x1xi32>
    %cst_3 = arith.constant 0.000000e+00 : f32
    %14 = vector.broadcast %cst_3 : f32 to vector<16x1xf32>
    %15 = arith.cmpf oge, %12, %14 : vector<16x1xf32>
    %16 = arith.extui %15 : vector<16x1xi1> to vector<16x1xi32>
    %17 = arith.sitofp %16 : vector<16x1xi32> to vector<16x1xf32>
    %c10_i32 = arith.constant 10 : i32
    %18 = vector.broadcast %c10_i32 : i32 to vector<1x128xi32>
    %19 = arith.cmpi slt, %4, %18 : vector<1x128xi32>
    %cst_4 = arith.constant -1.000000e+30 : f32
    %20 = vector.shape_cast %19 : vector<1x128xi1> to vector<1x128xi1>
    %21 = vector.broadcast %20 : vector<1x128xi1> to vector<16x128xi1>
    %22 = vector.broadcast %cst_4 : f32 to vector<16x128xf32>
    %23 = arith.select %21, %3, %22 : vector<16x128xi1>, vector<16x128xf32>
    %cst_5 = arith.constant dense<0xFF800000> : vector<16xf32>
    %24 = vector.multi_reduction <maximumf>, %23, %cst_5 [1] : vector<16x128xf32> to vector<16xf32>
    %25 = vector.shape_cast %24 : vector<16xf32> to vector<16x1xf32>
    %26 = vector.broadcast %25 : vector<16x1xf32> to vector<16x128xf32>
    %27 = arith.subf %23, %26 : vector<16x128xf32>
    %28 = math.exp %27 : vector<16x128xf32>
    %cst_6 = arith.constant dense<0.000000e+00> : vector<16xf32>
    %29 = vector.multi_reduction <add>, %28, %cst_6 [1] : vector<16x128xf32> to vector<16xf32>
    %30 = vector.shape_cast %29 : vector<16xf32> to vector<16x1xf32>
    %31 = math.log %30 : vector<16x1xf32>
    %32 = arith.addf %25, %31 : vector<16x1xf32>
    %33 = vector.broadcast %4 : vector<1x128xi32> to vector<16x128xi32>
    %34 = vector.broadcast %13 : vector<16x1xi32> to vector<16x128xi32>
    %35 = arith.cmpi eq, %33, %34 : vector<16x128xi32>
    %cst_7 = arith.constant 0.000000e+00 : f32
    %36 = vector.broadcast %cst_7 : f32 to vector<16x128xf32>
    %37 = arith.select %35, %23, %36 : vector<16x128xi1>, vector<16x128xf32>
    %cst_8 = arith.constant dense<0.000000e+00> : vector<16xf32>
    %38 = vector.multi_reduction <add>, %37, %cst_8 [1] : vector<16x128xf32> to vector<16xf32>
    %39 = vector.shape_cast %38 : vector<16xf32> to vector<16x1xf32>
    %40 = arith.subf %32, %39 : vector<16x1xf32>
    %cst_9 = arith.constant 0.000000e+00 : f32
    %41 = vector.broadcast %cst_9 : f32 to vector<16x1xf32>
    %42 = arith.subf %41, %40 : vector<16x1xf32>
    %43 = math.exp %42 : vector<16x1xf32>
    %cst_10 = arith.constant 1.000000e+00 : f32
    %44 = vector.broadcast %cst_10 : f32 to vector<16x1xf32>
    %45 = arith.subf %44, %43 : vector<16x1xf32>
    %cst_11 = arith.constant 0.000000e+00 : f32
    %46 = vector.broadcast %cst_11 : f32 to vector<16x1xf32>
    %47 = arith.maximumf %45, %46 : vector<16x1xf32>
    %cst_12 = arith.constant 1.000000e+00 : f32
    %48 = vector.broadcast %cst_12 : f32 to vector<16x1xf32>
    %49 = arith.mulf %48, %47 : vector<16x1xf32>
    %50 = arith.mulf %49, %47 : vector<16x1xf32>
    %51 = arith.mulf %50, %40 : vector<16x1xf32>
    %52 = arith.mulf %51, %17 : vector<16x1xf32>
    %c0_13 = arith.constant 0 : index
    %c0_14 = arith.constant 0 : index
    %53 = vector.load %arg3[%c0_13, %c0_14] : memref<1x128xf32, #tpu.memory_space<vmem>>, vector<1x128xf32>
    %54 = vector.shape_cast %52 : vector<16x1xf32> to vector<1x16x1xf32>
    %cst_15 = arith.constant dense<0.000000e+00> : vector<1xf32>
    %55 = vector.multi_reduction <add>, %54, %cst_15 [1, 2] : vector<1x16x1xf32> to vector<1xf32>
    %56 = vector.shape_cast %55 : vector<1xf32> to vector<1x1x1xf32>
    %57 = vector.extract %56[0, 0, 0] : f32 from vector<1x1x1xf32>
    %58 = vector.broadcast %57 : f32 to vector<1x128xf32>
    %59 = arith.addf %53, %58 : vector<1x128xf32>
    %c0_16 = arith.constant 0 : index
    %c0_17 = arith.constant 0 : index
    %60 = vector.load %arg3[%c0_16, %c0_17] : memref<1x128xf32, #tpu.memory_space<vmem>>, vector<1x128xf32>
    tpu.vector_store %arg3[%c0_16, %c0_17], %59 {strides = array<i32>} : memref<1x128xf32, #tpu.memory_space<vmem>>, vector<1x128xf32>,
    return
  }
  func.func @transform_0(%arg0: i32, %arg1: i32) -> (i32, i32) {
    %c1_i32 = arith.constant 1 : i32
    %0 = arith.muli %arg0, %c1_i32 : i32
    %1 = arith.addi %0, %arg1 : i32
    %c0_i32 = arith.constant 0 : i32
    %c0_i32_0 = arith.constant 0 : i32
    return %1, %c0_i32 : i32, i32
  }
  func.func @transform_1(%arg0: i32, %arg1: i32) -> (i32, i32) {
    %c0_i32 = arith.constant 0 : i32
    %c0_i32_0 = arith.constant 0 : i32
    return %c0_i32, %arg0 : i32, i32
  }
}

</mosaic_0001>

<bundles_post_ra>
// kernel: tpu_custom_call.1
= control target key start
LH: loop header
LB: loop body
LE: loop exit
PB: predicated region body
PF: predicated region fallthrough
CT: control target
= control target key end

     0   :  { %6 = vsyncpa [#allocation3], 0  ;;  %s249_s0 = inlined_call_operand.hbm [shape: f32[16,128], index: 0, kind: input, shape index: {}]   ;;  %s250_s1 = inlined_call_operand.hbm [shape: f32[1,128], index: 1, kind: output, shape index: {}]  }
   0x1   :  { %7 = vsyncpa [#allocation4], 0  ;;  %s16_s8 = sshll.u32 %s249_s0, 4  ;;  %s225_s9 = smov [#allocation2]   ;;  %s17_s8 = int_to_ptr.hbm [resolvable:$true] %s16_s8 }
   0x2   :  { %s18_s10 = sshll.u32 %s225_s9, 4  ;;  %s226_s11 = smov 128   ;;  %s19_s10 = int_to_ptr.vmem [resolvable:$true] %s18_s10 }
   0x3   :  { %s227_s12 = smov 8  }
   0x4   :  { %24 = dma.hbm_to_vmem [thread:$0]  %s17_s8, 256, %s19_s10, [#allocation3], %s226_s11, %s226_s11, %s227_s12  }
   0x5   :  { %221 = dma.done.wait [#allocation3], 256  }
   0x6   :  { %222 = vsyncadd [#allocation3], 4294967040  ;;  %v38_v0 = vlaneseq  ;;  %v228_v1 = vmov 0.0   ;;  %v36_v3 = vld [vmem:[#allocation2] sm:$0xff]  ;;  %v37_v6 = vld [vmem:[#allocation2 + $0x8] sm:$0xff]  ;;  %vm109_vm8 = vcmask 7168  }
   0x7   :  { %35 = vst [vmem:[#allocation5] sm:$0x1] %v228_v1  ;;  %s229_s0 = smov [#allocation5]   ;;  %s132_s16 = sshll.u32 %s250_s1, 4  ;;  %s133_s16 = int_to_ptr.hbm [resolvable:$true] %s132_s16 }
   0x8   :  { %v39_v2 = vand.u32 127, %v38_v0  ;;  %s130_s13 = sshll.u32 %s229_s0, 4  ;;  %s131_s13 = int_to_ptr.vmem [resolvable:$true] %s130_s13 }
   0xa   :  { %vm57_vm0 = vcmp.lt.s32.totalorder %v39_v2, 10  ;;  %vm40_vm1 = vcmp.eq.s32.totalorder %v39_v2, 127 }
   0xb   :  { %v60_v4 = vsel %vm57_vm0, %v36_v3, -1e+30  ;;  %v43_v5 = vsel %vm40_vm1, %v36_v3, 0.0  ;;  %v61_v7 = vsel %vm57_vm0, %v37_v6, -1e+30  ;;  %v44_v8 = vsel %vm40_vm1, %v37_v6, 0.0 }
   0xc   :  { %62 = vmax.xlane.f32.xlu0 %v60_v4  ;;  %45 = vadd.xlane.f32.xlu1 %v43_v5 }
   0xe   :  { %v108_v6 = vld [vmem:[#allocation5] sm:$0x1] }
  0x14   :  { %64 = vmax.xlane.f32.xlu0 %v61_v7  ;;  %47 = vadd.xlane.f32.xlu1 %v44_v8 }
  0x7f   :  { %v63_v9 = vpop.xlane.xlu0 %62  ;;  %v46_v10 = vpop.xlane.xlu1 %45 }
  0x80   :  { %v66_v11 = vsub.f32 %v60_v4, %v63_v9  ;;  %vm144_vm2 = vcmp.lt.s32.totalorder %v46_v10, 0  ;;  %v145_v12 = vceil.f32 %v46_v10  ;;  %v146_v13 = vfloor.f32 %v46_v10 }
  0x81   :  { %vm51_vm6 = vcmp.ge.f32.partialorder %v46_v10, 0.0 }
  0x82   :  { %v68_v14 = vmul.f32 1.442695, %v66_v11  ;;  %v147_v15 = vsel %vm144_vm2, %v145_v12, %v146_v13  ;;  %v142_v54 = vsel %vm51_vm6, 1.0, %v228_v1 }
  0x83   :  { %v148_v16 = vcvt.f32.s32 %v147_v15 }
  0x84   :  { %161 = vpow2.f32 %v68_v14 }
  0x85   :  { %vm82_vm3 = vcmp.eq.s32.totalorder %v39_v2, %v148_v16 }
  0x86   :  { %v84_v17 = vsel %vm82_vm3, %v60_v4, 0.0 }
  0x87   :  { %v65_v18 = vpop.xlane.xlu0 %64  ;;  %86 = vadd.xlane.f32.xlu0 %v84_v17  ;;  %v48_v19 = vpop.xlane.xlu1 %47 }
  0x88   :  { %v67_v20 = vsub.f32 %v61_v7, %v65_v18  ;;  %vm149_vm4 = vcmp.lt.s32.totalorder %v48_v19, 0  ;;  %v150_v21 = vceil.f32 %v48_v19  ;;  %v151_v22 = vfloor.f32 %v48_v19 }
  0x89   :  { %vm52_vm7 = vcmp.ge.f32.partialorder %v48_v19, 0.0 }
  0x8a   :  { %v162_v23 = vpop.eup %161  ;;  %v70_v24 = vmul.f32 1.442695, %v67_v20  ;;  %v152_v25 = vsel %vm149_vm4, %v150_v21, %v151_v22  ;;  %v143_v57 = vsel %vm52_vm7, 1.0, %v228_v1 }
  0x8b   :  { %72 = vadd.xlane.f32.xlu2 %v162_v23  ;;  %v153_v26 = vcvt.f32.s32 %v152_v25 }
  0x8c   :  { %163 = vpow2.f32 %v70_v24 }
  0x8d   :  { %vm83_vm5 = vcmp.eq.s32.totalorder %v39_v2, %v153_v26 }
  0x8e   :  { %v85_v27 = vsel %vm83_vm5, %v61_v7, 0.0 }
  0x8f   :  { %88 = vadd.xlane.f32.xlu1 %v85_v27 }
  0x92   :  { %v164_v28 = vpop.eup %163 }
  0x93   :  { %74 = vadd.xlane.f32.xlu2 %v164_v28 }
  0xfa   :  { %v87_v33 = vpop.xlane.xlu0 %86 }
  0xfe   :  { %v73_v29 = vpop.xlane.xlu2 %72 }
  0xff   :  { %165 = vlog2.f32 %v73_v29 }
 0x102   :  { %v89_v40 = vpop.xlane.xlu1 %88 }
 0x105   :  { %v166_v30 = vpop.eup %165 }
 0x106   :  { %v77_v31 = vmul.f32 0.6931472, %v166_v30  ;;  %v75_v32 = vpop.xlane.xlu2 %74 }
 0x107   :  { %167 = vlog2.f32 %v75_v32 }
 0x108   :  { %v80_v34 = vadd.f32 %v77_v31, %v63_v9 }
 0x10a   :  { %v90_v35 = vsub.f32 %v80_v34, %v87_v33 }
 0x10c   :  { %v92_v36 = vsub.f32 0.0, %v90_v35 }
 0x10d   :  { %v168_v37 = vpop.eup %167 }
 0x10e   :  { %v79_v38 = vmul.f32 0.6931472, %v168_v37  ;;  %v94_v39 = vmul.f32 1.442695, %v92_v36 }
 0x110   :  { %169 = vpow2.f32 %v94_v39  ;;  %v81_v41 = vadd.f32 %v79_v38, %v65_v18 }
 0x112   :  { %v91_v42 = vsub.f32 %v81_v41, %v89_v40 }
 0x114   :  { %v93_v43 = vsub.f32 0.0, %v91_v42 }
 0x116   :  { %v170_v44 = vpop.eup %169  ;;  %v96_v45 = vmul.f32 1.442695, %v93_v43 }
 0x117   :  { %v98_v46 = vsub.f32 1.0, %v170_v44 }
 0x118   :  { %171 = vpow2.f32 %v96_v45 }
 0x119   :  { %v100_v47 = vmax.f32 %v98_v46, 0.0 }
 0x11b   :  { %v102_v48 = vmul.f32 %v100_v47, %v100_v47 }
 0x11d   :  { %v104_v51 = vmul.f32 %v102_v48, %v90_v35 }
 0x11e   :  { %v172_v49 = vpop.eup %171 }
 0x11f   :  { %v99_v50 = vsub.f32 1.0, %v172_v49  ;;  %v106_v56 = vmul.f32 %v142_v54, %v104_v51 }
 0x121   :  { %v101_v52 = vmax.f32 %v99_v50, 0.0  ;;  %v110_v59 = vsel %vm109_vm8, %v106_v56, 0.0 }
 0x123   :  { %v103_v53 = vmul.f32 %v101_v52, %v101_v52 }
 0x125   :  { %v105_v55 = vmul.f32 %v103_v53, %v91_v42 }
 0x127   :  { %v107_v58 = vmul.f32 %v143_v57, %v105_v55 }
 0x129   :  { %v111_v60 = vsel %vm109_vm8, %v107_v58, 0.0 }
 0x12a   :  { %v112_v61 = vadd.f32 %v111_v60, %v110_v59 }
 0x12c   :  { %113 = vadd.xlane.f32.xlu2 %v112_v61 }
 0x19f   :  { %v114_v62 = vpop.xlane.xlu2 %113 }
 0x1a0   :  { %v115_v63 = vrot.slane %v114_v62, 4 }
 0x1a2   :  { %v116_v0 = vadd.f32 %v115_v63, %v114_v62 }
 0x1a4   :  { %v117_v2 = vrot.slane %v116_v0, 2 }
 0x1a6   :  { %v118_v3 = vadd.f32 %v117_v2, %v116_v0 }
 0x1a8   :  { %v119_v4 = vrot.slane %v118_v3, 1 }
 0x1aa   :  { %v120_v5 = vadd.f32 %v119_v4, %v118_v3 }
 0x1ac   :  { %154 = vpush %v120_v5 }
 0x1dd   :  { %s155_s17 = spop %154 }
 0x1de   :  { %v122_v1 = vstv %s155_s17 }
 0x1df   :  { %v123_v7 = vadd.f32 %v122_v1, %v108_v6 }
 0x1e1   :  { %124 = vst [vmem:[#allocation5] sm:$0x1] %v123_v7 }
 0x1e2   :  { %135 = dma.vmem_to_hbm [thread:$0]  %s131_s13, 16, %s133_s16, [#allocation4]  }
 0x1e3   :  { %223 = dma.done.wait [#allocation4], 16  }
 0x1e4   :  { %224 = vsyncadd [#allocation4], 4294967280 }
 0x1e5   :  { %140 = vsyncpa [#allocation3], 1 }
 0x1e6   :  { %141 = vsyncpa [#allocation4], 1 }

</bundles_post_ra>
